<compile_context>
chip_gen: v7x
topology: tpu7x:2x2x1
jax: 0.10.0
libtpu: 0.0.40
codegen_flags: <defaults>
</compile_context>

<pallas_src>
import functools

import numpy as np

import jax
import jax.numpy as jnp
from jax.experimental import pallas as pl
from jax.experimental.pallas import tpu as pltpu

EPS = 1e-3  # matches nn.BatchNorm1d(eps=0.001)


def _fused_forward_kernel(x_ref, mask_ref, wconv_ref, prm_ref, wl_ref, bl_ref,
                          out_ref, act_ref):
    """x: (B*W, D) f32; mask: (B*W, K) f32 halo validity; wconv: (K, D, Ctot)
    bf16; prm: (2, Ctot) f32 = [gamma; beta]; wl: (W, Ctot, N) bf16;
    bl: (1, N) f32; out: (B, N) f32; act scratch: (B*W, Ctot) f32."""
    BW, _ = x_ref.shape
    K, _, Ctot = wconv_ref.shape
    W, _, N = wl_ref.shape
    B = BW // W
    HALO = (K - 1) // 2  # = 2: "same" padding of the 5-tap conv

    x = x_ref[...]                                     # (B*W, D) f32
    mask = mask_ref[...]                               # (B*W, K) f32

    # ---- both Conv1d's via shift-and-matmul (no im2col scatter) ----------
    # acc[b*W+t, c] = sum_k sum_d x[b, t+k-HALO, d] * wconv[k, d, c]
    # TODO(synk): switch these static loops to lax.fori_loop(..., unroll=True)
    # if K / W ever grow beyond a few dozen iterations.
    acc = jnp.zeros((BW, Ctot), jnp.float32)
    for k in range(K):
        shift = (HALO - k) % BW                        # jnp.roll semantics
        xs = pltpu.roll(x, shift, axis=0) if shift else x   # xs[r] = x[r+k-HALO]
        xk = xs * mask[:, k:k + 1]                     # zero the padding-halo rows
        acc = acc + jnp.dot(xk.astype(jnp.bfloat16), wconv_ref[k],
                            preferred_element_type=jnp.float32)

    # ---- training-mode BatchNorm1d (batch stats, eps=1e-3) + ReLU ---------
    # Conv bias omitted on purpose: exactly cancelled by the mean subtraction.
    inv_n = 1.0 / float(BW)
    mean = jnp.sum(acc, axis=0, keepdims=True) * inv_n         # (1, Ctot)
    ex2 = jnp.sum(acc * acc, axis=0, keepdims=True) * inv_n
    var = ex2 - mean * mean                                    # biased variance
    gamma = prm_ref[0:1, :]
    beta = prm_ref[1:2, :]
    scale = gamma * jax.lax.rsqrt(var + EPS)                   # EUP rsqrt
    shift_aff = beta - mean * scale
    act_ref[...] = jnp.maximum(acc * scale + shift_aff, 0.0)   # (B*W, Ctot)

    # ---- concat/permute/Flatten folded into the Linear contraction -------
    # flat[b, t*Ctot + c] = act[b*W + t, c]   =>   out = sum_t act_t @ wl[t] + bl
    out = jnp.zeros((B, N), jnp.float32)
    for t in range(W):
        lhs = act_ref[pl.ds(t, B, stride=W), :]        # rows {t, t+W, ...}: (B, Ctot)
        out = out + jnp.dot(lhs.astype(jnp.bfloat16), wl_ref[t],
                            preferred_element_type=jnp.float32)
    out_ref[...] = out + bl_ref[...]


def prepare_params(params):
    """One-time static packing of the PyTorch-layout parameters."""
    w1 = params["conv1_w"].astype(jnp.float32)         # (C1, D, 5)
    w2 = params["conv2_w"].astype(jnp.float32)         # (C2, D, 3)
    C1, D, K1 = w1.shape
    C2, _, K2 = w2.shape
    off = (K1 - K2) // 2                                # both convs "same"-padded

    w1t = jnp.transpose(w1, (2, 1, 0))                  # (K1, D, C1)
    w2t = jnp.transpose(w2, (2, 1, 0))                  # (K2, D, C2)
    w2pad = jnp.zeros((K1, D, C2), jnp.float32).at[off:off + K2].set(w2t)
    wconv = jnp.concatenate([w1t, w2pad], axis=2).astype(jnp.bfloat16)  # (K1,D,Ctot)

    # Conv biases intentionally dropped (cancelled by training-mode BN).
    prm = jnp.stack([
        jnp.concatenate([params["bn1_g"], params["bn2_g"]]),
        jnp.concatenate([params["bn1_b"], params["bn2_b"]]),
    ]).astype(jnp.float32)                              # (2, Ctot)

    Ctot = C1 + C2
    wlT = jnp.transpose(params["lin_w"]).astype(jnp.float32)        # (W*Ctot, N)
    W = wlT.shape[0] // Ctot
    wl3 = wlT.reshape(W, Ctot, wlT.shape[1]).astype(jnp.bfloat16)   # (W, Ctot, N)
    bl = params["lin_b"].astype(jnp.float32).reshape(1, -1)         # (1, N)
    return {"wconv": wconv, "prm": prm, "wl": wl3, "bl": bl}


def _halo_masks(B, W, K):
    """mask[b*W + t, k] = 1.0 iff 0 <= t + k - (K-1)//2 < W  (static numpy)."""
    halo = (K - 1) // 2
    t = np.arange(W)[:, None]
    k = np.arange(K)[None, :]
    m = ((t >= halo - k) & (t < W + halo - k)).astype(np.float32)   # (W, K)
    return np.tile(m, (B, 1))                                       # (B*W, K)


@functools.partial(jax.jit, static_argnames=("predict",))
def conv1d_local_find_dif_forward(x, packed, predict=False):
    """x: (B, windowsize, Api_dim) or (windowsize, Api_dim) — same input the
    PyTorch module takes (before its internal permute)."""
    if x.ndim == 2:
        x = x[None]
    x = x.astype(jnp.float32)
    B, W, D = x.shape
    wconv, prm, wl3, bl = packed["wconv"], packed["prm"], packed["wl"], packed["bl"]
    K, _, Ctot = wconv.shape
    N = wl3.shape[2]

    x2d = x.reshape(B * W, D)                       # free: pure reshape
    mask = jnp.asarray(_halo_masks(B, W, K))        # trace-time constant

    vmem = pl.BlockSpec(memory_space=pltpu.MemorySpace.VMEM)
    # TODO(synk): training-mode BatchNorm couples every batch row, so the call
    # stays gridless (single block / one TensorCore). At real batch sizes, add
    # a leading "parallel" batch grid with a split BN-stats pass so v7x's
    # second core is used, and set vmem_limit_bytes if B*W grows large.
    logits = pl.pallas_call(
        _fused_forward_kernel,
        out_shape=jax.ShapeDtypeStruct((B, N), jnp.float32),
        in_specs=[vmem] * 6,
        out_specs=vmem,
        scratch_shapes=[pltpu.VMEM((B * W, Ctot), jnp.float32)],
    )(x2d, mask, wconv, prm, wl3, bl)

    if predict:
        # TODO(synk): matches the module's forward pass (training-mode BN
        # batch statistics), not PyTorch .eval() running-stats semantics.
        return jax.nn.softmax(logits, axis=-1)
    return logits


def reference_forward(x, params):
    """Pure-JAX reference with PyTorch semantics (training-mode BN, conv bias)."""
    if x.ndim == 2:
        x = x[None]
    x = x.astype(jnp.float32)
    xc = jnp.transpose(x, (0, 2, 1))                   # NCW

    def conv1d(xc, w, b, pad):
        out = jax.lax.conv_general_dilated(
            xc, w, window_strides=(1,), padding=[(pad, pad)],
            dimension_numbers=("NCH", "OIH", "NCH"))
        return out + b[None, :, None]

    def bn_relu(y, g, be):
        m = jnp.mean(y, axis=(0, 2), keepdims=True)
        v = jnp.mean((y - m) ** 2, axis=(0, 2), keepdims=True)
        yn = (y - m) / jnp.sqrt(v + EPS)
        return jnp.maximum(yn * g[None, :, None] + be[None, :, None], 0.0)

    c1 = bn_relu(conv1d(xc, params["conv1_w"], params["conv1_b"], 2),
                 params["bn1_g"], params["bn1_b"])
    c2 = bn_relu(conv1d(xc, params["conv2_w"], params["conv2_b"], 1),
                 params["bn2_g"], params["bn2_b"])
    allc = jnp.transpose(jnp.concatenate([c1, c2], axis=1), (0, 2, 1))
    flat = allc.reshape(allc.shape[0], -1)
    return flat @ params["lin_w"].T + params["lin_b"]


if __name__ == "__main__":
    # windowsize=16, Api_dim=8, Api_classnum=10, outchannels1=8, outchannels2=8
    B, W, D, C1, C2, N = 2, 16, 8, 8, 8, 10
    ks = jax.random.split(jax.random.PRNGKey(0), 11)
    params = dict(
        conv1_w=0.3 * jax.random.normal(ks[0], (C1, D, 5), jnp.float32),
        conv1_b=0.1 * jax.random.normal(ks[1], (C1,), jnp.float32),
        bn1_g=1.0 + 0.1 * jax.random.normal(ks[2], (C1,), jnp.float32),
        bn1_b=0.1 * jax.random.normal(ks[3], (C1,), jnp.float32),
        conv2_w=0.3 * jax.random.normal(ks[4], (C2, D, 3), jnp.float32),
        conv2_b=0.1 * jax.random.normal(ks[5], (C2,), jnp.float32),
        bn2_g=1.0 + 0.1 * jax.random.normal(ks[6], (C2,), jnp.float32),
        bn2_b=0.1 * jax.random.normal(ks[7], (C2,), jnp.float32),
        lin_w=0.1 * jax.random.normal(ks[8], (N, W * (C1 + C2)), jnp.float32),
        lin_b=0.1 * jax.random.normal(ks[9], (N,), jnp.float32),
    )
    x = jax.random.normal(ks[10], (B, W, D), jnp.float32)

    packed = prepare_params(params)
    out = jax.block_until_ready(conv1d_local_find_dif_forward(x, packed))
    ref = reference_forward(x, params)
    assert out.shape == (B, N)
    # bf16 MXU operands (f32 accumulation) -> slightly looser tolerance than a
    # pure-f32 comparison; still tight enough to catch any structural error.
    assert jnp.allclose(out, ref, atol=5e-2, rtol=5e-2), (out, ref)
    print("KERNEL_OK")
</pallas_src>

<mosaic_0001>
module attributes {stable_mosaic.version = 11 : i64} {
  func.func @_fused_forward_kernel(%arg0: memref<32x8xf32, #tpu.memory_space<vmem>>, %arg1: memref<32x5xf32, #tpu.memory_space<vmem>>, %arg2: memref<5x8x16xbf16, #tpu.memory_space<vmem>>, %arg3: memref<2x16xf32, #tpu.memory_space<vmem>>, %arg4: memref<16x16x10xbf16, #tpu.memory_space<vmem>>, %arg5: memref<1x10xf32, #tpu.memory_space<vmem>>, %arg6: memref<2x10xf32, #tpu.memory_space<vmem>>, %arg7: memref<32x16xf32, #tpu.memory_space<vmem>>) attributes {dimension_semantics = [], scalar_prefetch = 0 : i64, scratch_operands = 1 : i64, tpu.core_type = #tpu.core_type<tc>} {
    %c0 = arith.constant 0 : index
    %c0_0 = arith.constant 0 : index
    %0 = vector.load %arg0[%c0, %c0_0] : memref<32x8xf32, #tpu.memory_space<vmem>>, vector<32x8xf32>
    %c0_1 = arith.constant 0 : index
    %c0_2 = arith.constant 0 : index
    %1 = vector.load %arg1[%c0_1, %c0_2] : memref<32x5xf32, #tpu.memory_space<vmem>>, vector<32x5xf32>
    %cst = arith.constant 0.000000e+00 : f32
    %2 = vector.broadcast %cst : f32 to vector<32x16xf32>
    %c2_i32 = arith.constant 2 : i32
    %3 = tpu.dynamic_rotate %0 by %c2_i32 dim 0 : vector<32x8xf32>, i32 -> vector<32x8xf32>
    %4 = vector.extract_strided_slice %1 {offsets = [0, 0], sizes = [32, 1], strides = [1, 1]} : vector<32x5xf32> to vector<32x1xf32>
    %5 = vector.broadcast %4 : vector<32x1xf32> to vector<32x8xf32>
    %6 = arith.mulf %3, %5 : vector<32x8xf32>
    %7 = arith.truncf %6 : vector<32x8xf32> to vector<32x8xbf16>
    %c0_3 = arith.constant 0 : index
    %c0_4 = arith.constant 0 : index
    %c0_5 = arith.constant 0 : index
    %8 = vector.load %arg2[%c0_3, %c0_4, %c0_5] : memref<5x8x16xbf16, #tpu.memory_space<vmem>>, vector<1x8x16xbf16>
    %9 = vector.shape_cast %8 : vector<1x8x16xbf16> to vector<8x16xbf16>
    %cst_6 = arith.constant dense<0.000000e+00> : vector<32x16xf32>
    %10 = tpu.matmul %7, %9, %cst_6 {dimension_numbers = #tpu.dot_dimension_numbers<[1], [0], [0], [1], [0, 0, 1, 1], [], []>} : vector<32x8xbf16>, vector<8x16xbf16>, vector<32x16xf32> -> vector<32x16xf32>
    %11 = arith.addf %2, %10 : vector<32x16xf32>
    %c1_i32 = arith.constant 1 : i32
    %12 = tpu.dynamic_rotate %0 by %c1_i32 dim 0 : vector<32x8xf32>, i32 -> vector<32x8xf32>
    %13 = vector.extract_strided_slice %1 {offsets = [0, 1], sizes = [32, 1], strides = [1, 1]} : vector<32x5xf32> to vector<32x1xf32>
    %14 = vector.broadcast %13 : vector<32x1xf32> to vector<32x8xf32>
    %15 = arith.mulf %12, %14 : vector<32x8xf32>
    %16 = arith.truncf %15 : vector<32x8xf32> to vector<32x8xbf16>
    %c1 = arith.constant 1 : index
    %c0_7 = arith.constant 0 : index
    %c0_8 = arith.constant 0 : index
    %17 = vector.load %arg2[%c1, %c0_7, %c0_8] : memref<5x8x16xbf16, #tpu.memory_space<vmem>>, vector<1x8x16xbf16>
    %18 = vector.shape_cast %17 : vector<1x8x16xbf16> to vector<8x16xbf16>
    %cst_9 = arith.constant dense<0.000000e+00> : vector<32x16xf32>
    %19 = tpu.matmul %16, %18, %cst_9 {dimension_numbers = #tpu.dot_dimension_numbers<[1], [0], [0], [1], [0, 0, 1, 1], [], []>} : vector<32x8xbf16>, vector<8x16xbf16>, vector<32x16xf32> -> vector<32x16xf32>
    %20 = arith.addf %11, %19 : vector<32x16xf32>
    %21 = vector.extract_strided_slice %1 {offsets = [0, 2], sizes = [32, 1], strides = [1, 1]} : vector<32x5xf32> to vector<32x1xf32>
    %22 = vector.broadcast %21 : vector<32x1xf32> to vector<32x8xf32>
    %23 = arith.mulf %0, %22 : vector<32x8xf32>
    %24 = arith.truncf %23 : vector<32x8xf32> to vector<32x8xbf16>
    %c2 = arith.constant 2 : index
    %c0_10 = arith.constant 0 : index
    %c0_11 = arith.constant 0 : index
    %25 = vector.load %arg2[%c2, %c0_10, %c0_11] : memref<5x8x16xbf16, #tpu.memory_space<vmem>>, vector<1x8x16xbf16>
    %26 = vector.shape_cast %25 : vector<1x8x16xbf16> to vector<8x16xbf16>
    %cst_12 = arith.constant dense<0.000000e+00> : vector<32x16xf32>
    %27 = tpu.matmul %24, %26, %cst_12 {dimension_numbers = #tpu.dot_dimension_numbers<[1], [0], [0], [1], [0, 0, 1, 1], [], []>} : vector<32x8xbf16>, vector<8x16xbf16>, vector<32x16xf32> -> vector<32x16xf32>
    %28 = arith.addf %20, %27 : vector<32x16xf32>
    %c31_i32 = arith.constant 31 : i32
    %29 = tpu.dynamic_rotate %0 by %c31_i32 dim 0 : vector<32x8xf32>, i32 -> vector<32x8xf32>
    %30 = vector.extract_strided_slice %1 {offsets = [0, 3], sizes = [32, 1], strides = [1, 1]} : vector<32x5xf32> to vector<32x1xf32>
    %31 = vector.broadcast %30 : vector<32x1xf32> to vector<32x8xf32>
    %32 = arith.mulf %29, %31 : vector<32x8xf32>
    %33 = arith.truncf %32 : vector<32x8xf32> to vector<32x8xbf16>
    %c3 = arith.constant 3 : index
    %c0_13 = arith.constant 0 : index
    %c0_14 = arith.constant 0 : index
    %34 = vector.load %arg2[%c3, %c0_13, %c0_14] : memref<5x8x16xbf16, #tpu.memory_space<vmem>>, vector<1x8x16xbf16>
    %35 = vector.shape_cast %34 : vector<1x8x16xbf16> to vector<8x16xbf16>
    %cst_15 = arith.constant dense<0.000000e+00> : vector<32x16xf32>
    %36 = tpu.matmul %33, %35, %cst_15 {dimension_numbers = #tpu.dot_dimension_numbers<[1], [0], [0], [1], [0, 0, 1, 1], [], []>} : vector<32x8xbf16>, vector<8x16xbf16>, vector<32x16xf32> -> vector<32x16xf32>
    %37 = arith.addf %28, %36 : vector<32x16xf32>
    %c30_i32 = arith.constant 30 : i32
    %38 = tpu.dynamic_rotate %0 by %c30_i32 dim 0 : vector<32x8xf32>, i32 -> vector<32x8xf32>
    %39 = vector.extract_strided_slice %1 {offsets = [0, 4], sizes = [32, 1], strides = [1, 1]} : vector<32x5xf32> to vector<32x1xf32>
    %40 = vector.broadcast %39 : vector<32x1xf32> to vector<32x8xf32>
    %41 = arith.mulf %38, %40 : vector<32x8xf32>
    %42 = arith.truncf %41 : vector<32x8xf32> to vector<32x8xbf16>
    %c4 = arith.constant 4 : index
    %c0_16 = arith.constant 0 : index
    %c0_17 = arith.constant 0 : index
    %43 = vector.load %arg2[%c4, %c0_16, %c0_17] : memref<5x8x16xbf16, #tpu.memory_space<vmem>>, vector<1x8x16xbf16>
    %44 = vector.shape_cast %43 : vector<1x8x16xbf16> to vector<8x16xbf16>
    %cst_18 = arith.constant dense<0.000000e+00> : vector<32x16xf32>
    %45 = tpu.matmul %42, %44, %cst_18 {dimension_numbers = #tpu.dot_dimension_numbers<[1], [0], [0], [1], [0, 0, 1, 1], [], []>} : vector<32x8xbf16>, vector<8x16xbf16>, vector<32x16xf32> -> vector<32x16xf32>
    %46 = arith.addf %37, %45 : vector<32x16xf32>
    %cst_19 = arith.constant dense<0.000000e+00> : vector<16xf32>
    %47 = vector.multi_reduction <add>, %46, %cst_19 [0] : vector<32x16xf32> to vector<16xf32>
    %48 = vector.shape_cast %47 : vector<16xf32> to vector<1x16xf32>
    %cst_20 = arith.constant 3.125000e-02 : f32
    %49 = vector.broadcast %cst_20 : f32 to vector<1x16xf32>
    %50 = arith.mulf %48, %49 : vector<1x16xf32>
    %51 = arith.mulf %46, %46 : vector<32x16xf32>
    %cst_21 = arith.constant dense<0.000000e+00> : vector<16xf32>
    %52 = vector.multi_reduction <add>, %51, %cst_21 [0] : vector<32x16xf32> to vector<16xf32>
    %53 = vector.shape_cast %52 : vector<16xf32> to vector<1x16xf32>
    %cst_22 = arith.constant 3.125000e-02 : f32
    %54 = vector.broadcast %cst_22 : f32 to vector<1x16xf32>
    %55 = arith.mulf %53, %54 : vector<1x16xf32>
    %56 = arith.mulf %50, %50 : vector<1x16xf32>
    %57 = arith.subf %55, %56 : vector<1x16xf32>
    %c0_23 = arith.constant 0 : index
    %c0_24 = arith.constant 0 : index
    %58 = vector.load %arg3[%c0_23, %c0_24] : memref<2x16xf32, #tpu.memory_space<vmem>>, vector<1x16xf32>
    %c1_25 = arith.constant 1 : index
    %c0_26 = arith.constant 0 : index
    %59 = vector.load %arg3[%c1_25, %c0_26] : memref<2x16xf32, #tpu.memory_space<vmem>>, vector<1x16xf32>
    %cst_27 = arith.constant 1.000000e-03 : f32
    %60 = vector.broadcast %cst_27 : f32 to vector<1x16xf32>
    %61 = arith.addf %57, %60 : vector<1x16xf32>
    %62 = math.rsqrt %61 : vector<1x16xf32>
    %63 = arith.mulf %58, %62 : vector<1x16xf32>
    %64 = arith.mulf %50, %63 : vector<1x16xf32>
    %65 = arith.subf %59, %64 : vector<1x16xf32>
    %66 = vector.broadcast %63 : vector<1x16xf32> to vector<32x16xf32>
    %67 = arith.mulf %46, %66 : vector<32x16xf32>
    %68 = vector.broadcast %65 : vector<1x16xf32> to vector<32x16xf32>
    %69 = arith.addf %67, %68 : vector<32x16xf32>
    %cst_28 = arith.constant 0.000000e+00 : f32
    %70 = vector.broadcast %cst_28 : f32 to vector<32x16xf32>
    %71 = arith.maximumf %69, %70 : vector<32x16xf32>
    %c0_29 = arith.constant 0 : index
    %c0_30 = arith.constant 0 : index
    %72 = vector.load %arg7[%c0_29, %c0_30] : memref<32x16xf32, #tpu.memory_space<vmem>>, vector<32x16xf32>
    tpu.vector_store %arg7[%c0_29, %c0_30], %71 {strides = array<i32>} : memref<32x16xf32, #tpu.memory_space<vmem>>, vector<32x16xf32>,
    %cst_31 = arith.constant 0.000000e+00 : f32
    %73 = vector.broadcast %cst_31 : f32 to vector<2x10xf32>
    %c0_32 = arith.constant 0 : index
    %c0_33 = arith.constant 0 : index
    %74 = tpu.strided_load %arg7[%c0_32, %c0_33] {strides = array<i32: 16, 1>} : memref<32x16xf32, #tpu.memory_space<vmem>>, vector<2x16xf32>
    %75 = arith.truncf %74 : vector<2x16xf32> to vector<2x16xbf16>
    %c0_34 = arith.constant 0 : index
    %c0_35 = arith.constant 0 : index
    %c0_36 = arith.constant 0 : index
    %76 = vector.load %arg4[%c0_34, %c0_35, %c0_36] : memref<16x16x10xbf16, #tpu.memory_space<vmem>>, vector<1x16x10xbf16>
    %77 = vector.shape_cast %76 : vector<1x16x10xbf16> to vector<16x10xbf16>
    %cst_37 = arith.constant dense<0.000000e+00> : vector<2x10xf32>
    %78 = tpu.matmul %75, %77, %cst_37 {dimension_numbers = #tpu.dot_dimension_numbers<[1], [0], [0], [1], [0, 0, 1, 1], [], []>} : vector<2x16xbf16>, vector<16x10xbf16>, vector<2x10xf32> -> vector<2x10xf32>
    %79 = arith.addf %73, %78 : vector<2x10xf32>
    %c1_38 = arith.constant 1 : index
    %c0_39 = arith.constant 0 : index
    %80 = tpu.strided_load %arg7[%c1_38, %c0_39] {strides = array<i32: 16, 1>} : memref<32x16xf32, #tpu.memory_space<vmem>>, vector<2x16xf32>
    %81 = arith.truncf %80 : vector<2x16xf32> to vector<2x16xbf16>
    %c1_40 = arith.constant 1 : index
    %c0_41 = arith.constant 0 : index
    %c0_42 = arith.constant 0 : index
    %82 = vector.load %arg4[%c1_40, %c0_41, %c0_42] : memref<16x16x10xbf16, #tpu.memory_space<vmem>>, vector<1x16x10xbf16>
    %83 = vector.shape_cast %82 : vector<1x16x10xbf16> to vector<16x10xbf16>
    %cst_43 = arith.constant dense<0.000000e+00> : vector<2x10xf32>
    %84 = tpu.matmul %81, %83, %cst_43 {dimension_numbers = #tpu.dot_dimension_numbers<[1], [0], [0], [1], [0, 0, 1, 1], [], []>} : vector<2x16xbf16>, vector<16x10xbf16>, vector<2x10xf32> -> vector<2x10xf32>
    %85 = arith.addf %79, %84 : vector<2x10xf32>
    %c2_44 = arith.constant 2 : index
    %c0_45 = arith.constant 0 : index
    %86 = tpu.strided_load %arg7[%c2_44, %c0_45] {strides = array<i32: 16, 1>} : memref<32x16xf32, #tpu.memory_space<vmem>>, vector<2x16xf32>
    %87 = arith.truncf %86 : vector<2x16xf32> to vector<2x16xbf16>
    %c2_46 = arith.constant 2 : index
    %c0_47 = arith.constant 0 : index
    %c0_48 = arith.constant 0 : index
    %88 = vector.load %arg4[%c2_46, %c0_47, %c0_48] : memref<16x16x10xbf16, #tpu.memory_space<vmem>>, vector<1x16x10xbf16>
    %89 = vector.shape_cast %88 : vector<1x16x10xbf16> to vector<16x10xbf16>
    %cst_49 = arith.constant dense<0.000000e+00> : vector<2x10xf32>
    %90 = tpu.matmul %87, %89, %cst_49 {dimension_numbers = #tpu.dot_dimension_numbers<[1], [0], [0], [1], [0, 0, 1, 1], [], []>} : vector<2x16xbf16>, vector<16x10xbf16>, vector<2x10xf32> -> vector<2x10xf32>
    %91 = arith.addf %85, %90 : vector<2x10xf32>
    %c3_50 = arith.constant 3 : index
    %c0_51 = arith.constant 0 : index
    %92 = tpu.strided_load %arg7[%c3_50, %c0_51] {strides = array<i32: 16, 1>} : memref<32x16xf32, #tpu.memory_space<vmem>>, vector<2x16xf32>
    %93 = arith.truncf %92 : vector<2x16xf32> to vector<2x16xbf16>
    %c3_52 = arith.constant 3 : index
    %c0_53 = arith.constant 0 : index
    %c0_54 = arith.constant 0 : index
    %94 = vector.load %arg4[%c3_52, %c0_53, %c0_54] : memref<16x16x10xbf16, #tpu.memory_space<vmem>>, vector<1x16x10xbf16>
    %95 = vector.shape_cast %94 : vector<1x16x10xbf16> to vector<16x10xbf16>
    %cst_55 = arith.constant dense<0.000000e+00> : vector<2x10xf32>
    %96 = tpu.matmul %93, %95, %cst_55 {dimension_numbers = #tpu.dot_dimension_numbers<[1], [0], [0], [1], [0, 0, 1, 1], [], []>} : vector<2x16xbf16>, vector<16x10xbf16>, vector<2x10xf32> -> vector<2x10xf32>
    %97 = arith.addf %91, %96 : vector<2x10xf32>
    %c4_56 = arith.constant 4 : index
    %c0_57 = arith.constant 0 : index
    %98 = tpu.strided_load %arg7[%c4_56, %c0_57] {strides = array<i32: 16, 1>} : memref<32x16xf32, #tpu.memory_space<vmem>>, vector<2x16xf32>
    %99 = arith.truncf %98 : vector<2x16xf32> to vector<2x16xbf16>
    %c4_58 = arith.constant 4 : index
    %c0_59 = arith.constant 0 : index
    %c0_60 = arith.constant 0 : index
    %100 = vector.load %arg4[%c4_58, %c0_59, %c0_60] : memref<16x16x10xbf16, #tpu.memory_space<vmem>>, vector<1x16x10xbf16>
    %101 = vector.shape_cast %100 : vector<1x16x10xbf16> to vector<16x10xbf16>
    %cst_61 = arith.constant dense<0.000000e+00> : vector<2x10xf32>
    %102 = tpu.matmul %99, %101, %cst_61 {dimension_numbers = #tpu.dot_dimension_numbers<[1], [0], [0], [1], [0, 0, 1, 1], [], []>} : vector<2x16xbf16>, vector<16x10xbf16>, vector<2x10xf32> -> vector<2x10xf32>
    %103 = arith.addf %97, %102 : vector<2x10xf32>
    %c5 = arith.constant 5 : index
    %c0_62 = arith.constant 0 : index
    %104 = tpu.strided_load %arg7[%c5, %c0_62] {strides = array<i32: 16, 1>} : memref<32x16xf32, #tpu.memory_space<vmem>>, vector<2x16xf32>
    %105 = arith.truncf %104 : vector<2x16xf32> to vector<2x16xbf16>
    %c5_63 = arith.constant 5 : index
    %c0_64 = arith.constant 0 : index
    %c0_65 = arith.constant 0 : index
    %106 = vector.load %arg4[%c5_63, %c0_64, %c0_65] : memref<16x16x10xbf16, #tpu.memory_space<vmem>>, vector<1x16x10xbf16>
    %107 = vector.shape_cast %106 : vector<1x16x10xbf16> to vector<16x10xbf16>
    %cst_66 = arith.constant dense<0.000000e+00> : vector<2x10xf32>
    %108 = tpu.matmul %105, %107, %cst_66 {dimension_numbers = #tpu.dot_dimension_numbers<[1], [0], [0], [1], [0, 0, 1, 1], [], []>} : vector<2x16xbf16>, vector<16x10xbf16>, vector<2x10xf32> -> vector<2x10xf32>
    %109 = arith.addf %103, %108 : vector<2x10xf32>
    %c6 = arith.constant 6 : index
    %c0_67 = arith.constant 0 : index
    %110 = tpu.strided_load %arg7[%c6, %c0_67] {strides = array<i32: 16, 1>} : memref<32x16xf32, #tpu.memory_space<vmem>>, vector<2x16xf32>
    %111 = arith.truncf %110 : vector<2x16xf32> to vector<2x16xbf16>
    %c6_68 = arith.constant 6 : index
    %c0_69 = arith.constant 0 : index
    %c0_70 = arith.constant 0 : index
    %112 = vector.load %arg4[%c6_68, %c0_69, %c0_70] : memref<16x16x10xbf16, #tpu.memory_space<vmem>>, vector<1x16x10xbf16>
    %113 = vector.shape_cast %112 : vector<1x16x10xbf16> to vector<16x10xbf16>
    %cst_71 = arith.constant dense<0.000000e+00> : vector<2x10xf32>
    %114 = tpu.matmul %111, %113, %cst_71 {dimension_numbers = #tpu.dot_dimension_numbers<[1], [0], [0], [1], [0, 0, 1, 1], [], []>} : vector<2x16xbf16>, vector<16x10xbf16>, vector<2x10xf32> -> vector<2x10xf32>
    %115 = arith.addf %109, %114 : vector<2x10xf32>
    %c7 = arith.constant 7 : index
    %c0_72 = arith.constant 0 : index
    %116 = tpu.strided_load %arg7[%c7, %c0_72] {strides = array<i32: 16, 1>} : memref<32x16xf32, #tpu.memory_space<vmem>>, vector<2x16xf32>
    %117 = arith.truncf %116 : vector<2x16xf32> to vector<2x16xbf16>
    %c7_73 = arith.constant 7 : index
    %c0_74 = arith.constant 0 : index
    %c0_75 = arith.constant 0 : index
    %118 = vector.load %arg4[%c7_73, %c0_74, %c0_75] : memref<16x16x10xbf16, #tpu.memory_space<vmem>>, vector<1x16x10xbf16>
    %119 = vector.shape_cast %118 : vector<1x16x10xbf16> to vector<16x10xbf16>
    %cst_76 = arith.constant dense<0.000000e+00> : vector<2x10xf32>
    %120 = tpu.matmul %117, %119, %cst_76 {dimension_numbers = #tpu.dot_dimension_numbers<[1], [0], [0], [1], [0, 0, 1, 1], [], []>} : vector<2x16xbf16>, vector<16x10xbf16>, vector<2x10xf32> -> vector<2x10xf32>
    %121 = arith.addf %115, %120 : vector<2x10xf32>
    %c8 = arith.constant 8 : index
    %c0_77 = arith.constant 0 : index
    %122 = tpu.strided_load %arg7[%c8, %c0_77] {strides = array<i32: 16, 1>} : memref<32x16xf32, #tpu.memory_space<vmem>>, vector<2x16xf32>
    %123 = arith.truncf %122 : vector<2x16xf32> to vector<2x16xbf16>
    %c8_78 = arith.constant 8 : index
    %c0_79 = arith.constant 0 : index
    %c0_80 = arith.constant 0 : index
    %124 = vector.load %arg4[%c8_78, %c0_79, %c0_80] : memref<16x16x10xbf16, #tpu.memory_space<vmem>>, vector<1x16x10xbf16>
    %125 = vector.shape_cast %124 : vector<1x16x10xbf16> to vector<16x10xbf16>
    %cst_81 = arith.constant dense<0.000000e+00> : vector<2x10xf32>
    %126 = tpu.matmul %123, %125, %cst_81 {dimension_numbers = #tpu.dot_dimension_numbers<[1], [0], [0], [1], [0, 0, 1, 1], [], []>} : vector<2x16xbf16>, vector<16x10xbf16>, vector<2x10xf32> -> vector<2x10xf32>
    %127 = arith.addf %121, %126 : vector<2x10xf32>
    %c9 = arith.constant 9 : index
    %c0_82 = arith.constant 0 : index
    %128 = tpu.strided_load %arg7[%c9, %c0_82] {strides = array<i32: 16, 1>} : memref<32x16xf32, #tpu.memory_space<vmem>>, vector<2x16xf32>
    %129 = arith.truncf %128 : vector<2x16xf32> to vector<2x16xbf16>
    %c9_83 = arith.constant 9 : index
    %c0_84 = arith.constant 0 : index
    %c0_85 = arith.constant 0 : index
    %130 = vector.load %arg4[%c9_83, %c0_84, %c0_85] : memref<16x16x10xbf16, #tpu.memory_space<vmem>>, vector<1x16x10xbf16>
    %131 = vector.shape_cast %130 : vector<1x16x10xbf16> to vector<16x10xbf16>
    %cst_86 = arith.constant dense<0.000000e+00> : vector<2x10xf32>
    %132 = tpu.matmul %129, %131, %cst_86 {dimension_numbers = #tpu.dot_dimension_numbers<[1], [0], [0], [1], [0, 0, 1, 1], [], []>} : vector<2x16xbf16>, vector<16x10xbf16>, vector<2x10xf32> -> vector<2x10xf32>
    %133 = arith.addf %127, %132 : vector<2x10xf32>
    %c10 = arith.constant 10 : index
    %c0_87 = arith.constant 0 : index
    %134 = tpu.strided_load %arg7[%c10, %c0_87] {strides = array<i32: 16, 1>} : memref<32x16xf32, #tpu.memory_space<vmem>>, vector<2x16xf32>
    %135 = arith.truncf %134 : vector<2x16xf32> to vector<2x16xbf16>
    %c10_88 = arith.constant 10 : index
    %c0_89 = arith.constant 0 : index
    %c0_90 = arith.constant 0 : index
    %136 = vector.load %arg4[%c10_88, %c0_89, %c0_90] : memref<16x16x10xbf16, #tpu.memory_space<vmem>>, vector<1x16x10xbf16>
    %137 = vector.shape_cast %136 : vector<1x16x10xbf16> to vector<16x10xbf16>
    %cst_91 = arith.constant dense<0.000000e+00> : vector<2x10xf32>
    %138 = tpu.matmul %135, %137, %cst_91 {dimension_numbers = #tpu.dot_dimension_numbers<[1], [0], [0], [1], [0, 0, 1, 1], [], []>} : vector<2x16xbf16>, vector<16x10xbf16>, vector<2x10xf32> -> vector<2x10xf32>
    %139 = arith.addf %133, %138 : vector<2x10xf32>
    %c11 = arith.constant 11 : index
    %c0_92 = arith.constant 0 : index
    %140 = tpu.strided_load %arg7[%c11, %c0_92] {strides = array<i32: 16, 1>} : memref<32x16xf32, #tpu.memory_space<vmem>>, vector<2x16xf32>
    %141 = arith.truncf %140 : vector<2x16xf32> to vector<2x16xbf16>
    %c11_93 = arith.constant 11 : index
    %c0_94 = arith.constant 0 : index
    %c0_95 = arith.constant 0 : index
    %142 = vector.load %arg4[%c11_93, %c0_94, %c0_95] : memref<16x16x10xbf16, #tpu.memory_space<vmem>>, vector<1x16x10xbf16>
    %143 = vector.shape_cast %142 : vector<1x16x10xbf16> to vector<16x10xbf16>
    %cst_96 = arith.constant dense<0.000000e+00> : vector<2x10xf32>
    %144 = tpu.matmul %141, %143, %cst_96 {dimension_numbers = #tpu.dot_dimension_numbers<[1], [0], [0], [1], [0, 0, 1, 1], [], []>} : vector<2x16xbf16>, vector<16x10xbf16>, vector<2x10xf32> -> vector<2x10xf32>
    %145 = arith.addf %139, %144 : vector<2x10xf32>
    %c12 = arith.constant 12 : index
    %c0_97 = arith.constant 0 : index
    %146 = tpu.strided_load %arg7[%c12, %c0_97] {strides = array<i32: 16, 1>} : memref<32x16xf32, #tpu.memory_space<vmem>>, vector<2x16xf32>
    %147 = arith.truncf %146 : vector<2x16xf32> to vector<2x16xbf16>
    %c12_98 = arith.constant 12 : index
    %c0_99 = arith.constant 0 : index
    %c0_100 = arith.constant 0 : index
    %148 = vector.load %arg4[%c12_98, %c0_99, %c0_100] : memref<16x16x10xbf16, #tpu.memory_space<vmem>>, vector<1x16x10xbf16>
    %149 = vector.shape_cast %148 : vector<1x16x10xbf16> to vector<16x10xbf16>
    %cst_101 = arith.constant dense<0.000000e+00> : vector<2x10xf32>
    %150 = tpu.matmul %147, %149, %cst_101 {dimension_numbers = #tpu.dot_dimension_numbers<[1], [0], [0], [1], [0, 0, 1, 1], [], []>} : vector<2x16xbf16>, vector<16x10xbf16>, vector<2x10xf32> -> vector<2x10xf32>
    %151 = arith.addf %145, %150 : vector<2x10xf32>
    %c13 = arith.constant 13 : index
    %c0_102 = arith.constant 0 : index
    %152 = tpu.strided_load %arg7[%c13, %c0_102] {strides = array<i32: 16, 1>} : memref<32x16xf32, #tpu.memory_space<vmem>>, vector<2x16xf32>
    %153 = arith.truncf %152 : vector<2x16xf32> to vector<2x16xbf16>
    %c13_103 = arith.constant 13 : index
    %c0_104 = arith.constant 0 : index
    %c0_105 = arith.constant 0 : index
    %154 = vector.load %arg4[%c13_103, %c0_104, %c0_105] : memref<16x16x10xbf16, #tpu.memory_space<vmem>>, vector<1x16x10xbf16>
    %155 = vector.shape_cast %154 : vector<1x16x10xbf16> to vector<16x10xbf16>
    %cst_106 = arith.constant dense<0.000000e+00> : vector<2x10xf32>
    %156 = tpu.matmul %153, %155, %cst_106 {dimension_numbers = #tpu.dot_dimension_numbers<[1], [0], [0], [1], [0, 0, 1, 1], [], []>} : vector<2x16xbf16>, vector<16x10xbf16>, vector<2x10xf32> -> vector<2x10xf32>
    %157 = arith.addf %151, %156 : vector<2x10xf32>
    %c14 = arith.constant 14 : index
    %c0_107 = arith.constant 0 : index
    %158 = tpu.strided_load %arg7[%c14, %c0_107] {strides = array<i32: 16, 1>} : memref<32x16xf32, #tpu.memory_space<vmem>>, vector<2x16xf32>
    %159 = arith.truncf %158 : vector<2x16xf32> to vector<2x16xbf16>
    %c14_108 = arith.constant 14 : index
    %c0_109 = arith.constant 0 : index
    %c0_110 = arith.constant 0 : index
    %160 = vector.load %arg4[%c14_108, %c0_109, %c0_110] : memref<16x16x10xbf16, #tpu.memory_space<vmem>>, vector<1x16x10xbf16>
    %161 = vector.shape_cast %160 : vector<1x16x10xbf16> to vector<16x10xbf16>
    %cst_111 = arith.constant dense<0.000000e+00> : vector<2x10xf32>
    %162 = tpu.matmul %159, %161, %cst_111 {dimension_numbers = #tpu.dot_dimension_numbers<[1], [0], [0], [1], [0, 0, 1, 1], [], []>} : vector<2x16xbf16>, vector<16x10xbf16>, vector<2x10xf32> -> vector<2x10xf32>
    %163 = arith.addf %157, %162 : vector<2x10xf32>
    %c15 = arith.constant 15 : index
    %c0_112 = arith.constant 0 : index
    %164 = tpu.strided_load %arg7[%c15, %c0_112] {strides = array<i32: 16, 1>} : memref<32x16xf32, #tpu.memory_space<vmem>>, vector<2x16xf32>
    %165 = arith.truncf %164 : vector<2x16xf32> to vector<2x16xbf16>
    %c15_113 = arith.constant 15 : index
    %c0_114 = arith.constant 0 : index
    %c0_115 = arith.constant 0 : index
    %166 = vector.load %arg4[%c15_113, %c0_114, %c0_115] : memref<16x16x10xbf16, #tpu.memory_space<vmem>>, vector<1x16x10xbf16>
    %167 = vector.shape_cast %166 : vector<1x16x10xbf16> to vector<16x10xbf16>
    %cst_116 = arith.constant dense<0.000000e+00> : vector<2x10xf32>
    %168 = tpu.matmul %165, %167, %cst_116 {dimension_numbers = #tpu.dot_dimension_numbers<[1], [0], [0], [1], [0, 0, 1, 1], [], []>} : vector<2x16xbf16>, vector<16x10xbf16>, vector<2x10xf32> -> vector<2x10xf32>
    %169 = arith.addf %163, %168 : vector<2x10xf32>
    %c0_117 = arith.constant 0 : index
    %c0_118 = arith.constant 0 : index
    %170 = vector.load %arg5[%c0_117, %c0_118] : memref<1x10xf32, #tpu.memory_space<vmem>>, vector<1x10xf32>
    %171 = vector.broadcast %170 : vector<1x10xf32> to vector<2x10xf32>
    %172 = arith.addf %169, %171 : vector<2x10xf32>
    %c0_119 = arith.constant 0 : index
    %c0_120 = arith.constant 0 : index
    %173 = vector.load %arg6[%c0_119, %c0_120] : memref<2x10xf32, #tpu.memory_space<vmem>>, vector<2x10xf32>
    tpu.vector_store %arg6[%c0_119, %c0_120], %172 {strides = array<i32>} : memref<2x10xf32, #tpu.memory_space<vmem>>, vector<2x10xf32>,
    return
  }
}

</mosaic_0001>

<bundles_post_ra>
// kernel: conv1d_local_find_dif_forward.1
= control target key start
LH: loop header
LB: loop body
LE: loop exit
PB: predicated region body
PF: predicated region fallthrough
CT: control target
= control target key end

     0   :  { %v1811_v2 = vmov 1   ;;  %vm111_vm0 = vcmask 1043456   ;;  %v1812_v8 = vmov 0   ;;  %s2121_s0 = inlined_call_operand.vmem [shape: f32[32,8], index: 0, kind: input, shape index: {}]   ;;  %s2122_s1 = inlined_call_operand.vmem [shape: f32[32,5], index: 1, kind: input, shape index: {}]   ;;  %s2123_s2 = inlined_call_operand.vmem [shape: bf16[5,8,16], index: 2, kind: input, shape index: {}]   ;;  %s2124_s3 = inlined_call_operand.vmem [shape: f32[2,16], index: 3, kind: input, shape index: {}]   ;;  %s2125_s4 = inlined_call_operand.vmem [shape: bf16[16,16,10], index: 4, kind: input, shape index: {}]   ;;  %s2126_s5 = inlined_call_operand.vmem [shape: f32[1,10], index: 5, kind: input, shape index: {}]   ;;  %s2127_s6 = inlined_call_operand.hbm [shape: f32[2,10], index: 6, kind: output, shape index: {}]  }
   0x1   :  { %v31_v0 = vld [vmem:[%s2122_s1 + $0x10] sm:$0xff]  ;;  %v29_v1 = vld [vmem:[%s2122_s1] sm:$0xff]  ;;  %1760 = vset.pattern.permute.xlu1 %v1811_v2  ;;  %1759 = vset.pattern.permute.xlu0 %v1811_v2  ;;  %v32_v3 = vld [vmem:[%s2122_s1 + $0x18] sm:$0xff] }
   0x2   :  { %89 = vperm.xlu1 %1760, %v31_v0   ;;  %81 = vperm.xlu0 %1759, %v29_v1   ;;  %v30_v4 = vld [vmem:[%s2122_s1 + $0x8] sm:$0xff]  ;;  %v1480_v5 = vld [vmem:[%s2123_s2 + $0x4] sm:$0xf]  ;;  %v1874_v7 = vld [vmem:[%s2123_s2] sm:$0xf] }
   0x3   :  { %1746 = vmatprep.subr.msk.bf16.mxu0 %vm111_vm0, %v1480_v5  ;;  %v113_v6 = vsel %vm111_vm0, %v1480_v5, 0 }
   0x4   :  { %1605 = vmatpush3.bf16.msra.mxu0 %v113_v6 }
   0x5   :  { %1747 = vmatprep.subr.msk.bf16.mxu0 %vm111_vm0, %v1874_v7 }
   0x6   :  { %93 = vperm.xlu1 %1760, %v32_v3   ;;  %85 = vperm.xlu0 %1759, %v30_v4  }
   0xa   :  { %1762 = vset.pattern.permute.xlu1 %v1812_v8  ;;  %1761 = vset.pattern.permute.xlu0 %v1812_v8 }
   0xb   :  { %51 = vperm.xlu1 %1762, %v30_v4   ;;  %46 = vperm.xlu0 %1761, %v29_v1  }
   0xf   :  { %56 = vperm.xlu1 %1762, %v31_v0   ;;  %61 = vperm.xlu0 %1761, %v32_v3  }
  0x10   :  { %11 = vsyncpa [#allocation4], 0  ;;  %v1813_v9 = vmov 2   ;;  %v1814_v10 = vmov 3   ;;  %v1815_v11 = vmov 4   ;;  %v37_v12 = vlaneseq  ;;  %v1881_v13 = vld [vmem:[%s2121_s0 + $0x8] sm:$0xff] }
  0x11   :  { %v1888_v15 = vld [vmem:[%s2121_s0 + $0x10] sm:$0xff]  ;;  %v1893_v16 = vld [vmem:[%s2121_s0] sm:$0xff]  ;;  %v1898_v17 = vld [vmem:[%s2121_s0 + $0x18] sm:$0xff]  ;;  %v72_v18 = vrot.slane %v1881_v13, 7  ;;  %v34_v29 = vrot.slane %v1881_v13, 6  ;;  %vm104_vm3 = vcmask 64512  }
  0x12   :  { %v1883_v14 = vshrl.u32 %v37_v12, 7  ;;  %v73_v19 = vrot.slane %v1888_v15, 7  ;;  %v71_v20 = vrot.slane %v1893_v16, 7  ;;  %v74_v21 = vrot.slane %v1898_v17, 7  ;;  %v1485_v45 = vld [vmem:[%s2123_s2 + $0x8] sm:$0xf] }
  0x13   :  { %1763 = vset.pattern.permute.xlu1 %v1813_v9  ;;  %1764 = vset.pattern.permute.xlu0 %v1813_v9  ;;  %v33_v28 = vrot.slane %v1893_v16, 6  ;;  %v36_v30 = vrot.slane %v1898_v17, 6  ;;  %v171_v41 = vsel %vm111_vm0, %v1874_v7, 0  ;;  %v35_v44 = vrot.slane %v1888_v15, 6  ;;  %v1488_v62 = vld [vmem:[%s2123_s2 + $0xc] sm:$0xf] }
  0x14   :  { %223 = vperm.xlu1 %1763, %v29_v1   ;;  %227 = vperm.xlu0 %1764, %v30_v4   ;;  %vm75_vm1 = vcmp.lt.s32.totalorder %v1883_v14, 1  ;;  %vm39_vm2 = vcmp.lt.s32.totalorder %v1883_v14, 2  ;;  %v253_v60 = vsel %vm111_vm0, %v1485_v45, 0  ;;  %vm312_vm4 = vcmp.lt.s32.totalorder %v1883_v14, 7  ;;  %s1818_s28 = smov [#allocation3]  }
  0x15   :  { %v77_v24 = vsel %vm75_vm1, %v72_v18, %v73_v19  ;;  %v79_v25 = vsel %vm75_vm1, %v74_v21, %v71_v20  ;;  %v76_v26 = vsel %vm75_vm1, %v73_v19, %v74_v21  ;;  %v78_v27 = vsel %vm75_vm1, %v71_v20, %v72_v18  ;;  %s1472_s29 = sshll.u32 %s1818_s28, 4  ;;  %s1473_s29 = int_to_ptr.vmem [resolvable:$true] %s1472_s29 }
  0x16   :  { %v42_v38 = vsel %vm39_vm2, %v33_v28, %v34_v29  ;;  %v43_v39 = vsel %vm39_vm2, %v36_v30, %v33_v28  ;;  %v41_v50 = vsel %vm39_vm2, %v34_v29, %v35_v44  ;;  %v40_v52 = vsel %vm39_vm2, %v35_v44, %v36_v30  ;;  %s1787_s30 = scalar_lea.vmem %s1473_s29, 32  ;;  %p1792_p1 = scmp.lt.s32.totalorder %s1473_s29, %s1473_s29 }
  0x17   :  { %v310_v2 = vrot.slane %v1888_v15, 1  ;;  %v404_v20 = vrot.slane %v1881_v13, 2  ;;  %v405_v21 = vrot.slane %v1888_v15, 2  ;;  %vm407_vm5 = vcmp.lt.s32.totalorder %v1883_v14, 6  ;;  %p1788_p0 = scmp.ne.s32.totalorder %s1473_s29, %s1787_s30  ;;  %p1793_p2 = scmp.lt.s32.totalorder %s1787_s30, %s1787_s30 }
  0x18   :  { %231 = vperm.xlu1 %1763, %v31_v0   ;;  %1765 = vset.pattern.permute.xlu0 %v1814_v10  ;;  %vm1817_vm6 = vmmov 0   ;;  %vm498_vm7 = vcmask 130048   ;;  %vm1464_vm8 = vcmask 74752  }
  0x19   :  { %318 = vperm.xlu0 %1765, %v29_v1   ;;  %p1794_p3 = por %p1793_p2, %p1792_p1 }
  0x1b   :  { %p1795_p4 = pnand %p1794_p3, %p1788_p0 }
  0x1c   :  { %235 = vperm.xlu1 %1763, %v32_v3  }
  0x1d   :  { %330 = vperm.xlu0 %1765, %v32_v3  }
  0x20   :  { %1766 = vset.pattern.permute.xlu1 %v1814_v10 }
  0x21   :  { %322 = vperm.xlu1 %1766, %v30_v4   ;;  %1768 = vset.pattern.permute.xlu0 %v1815_v11 }
  0x22   :  { %417 = vperm.xlu0 %1768, %v30_v4  }
  0x25   :  { %326 = vperm.xlu1 %1766, %v31_v0  }
  0x29   :  { %1767 = vset.pattern.permute.xlu1 %v1815_v11  ;;  %v348_v11 = vsel %vm111_vm0, %v1488_v62, 0 }
  0x2a   :  { %413 = vperm.xlu1 %1767, %v29_v1   ;;  %v308_v1 = vrot.slane %v1893_v16, 1 }
  0x2e   :  { %421 = vperm.xlu1 %1767, %v31_v0   ;;  %v309_v0 = vrot.slane %v1881_v13, 1 }
  0x30   :  { %v315_v5 = vsel %vm312_vm4, %v308_v1, %v309_v0  ;;  %v314_v7 = vsel %vm312_vm4, %v309_v0, %v310_v2 }
  0x32   :  { %425 = vperm.xlu1 %1767, %v32_v3  }
  0x81   :  { %v90_v22 = vpop.permute.xlu1 %89  ;;  %v82_v23 = vpop.permute.xlu0 %81 }
  0x82   :  { %v98_v33 = vmul.f32 %v90_v22, %v77_v24  ;;  %v96_v34 = vmul.f32 %v82_v23, %v79_v25  ;;  %v311_v22 = vrot.slane %v1898_v17, 1  ;;  %v1491_v23 = vld [vmem:[%s2123_s2 + $0x10] sm:$0xf]  ;;  %v403_v25 = vrot.slane %v1893_v16, 2 }
  0x84   :  { %v316_v28 = vsel %vm312_vm4, %v311_v22, %v308_v1  ;;  %v410_v29 = vsel %vm407_vm5, %v403_v25, %v404_v20 }
  0x85   :  { %v94_v31 = vpop.permute.xlu1 %93  ;;  %v86_v32 = vpop.permute.xlu0 %85 }
  0x86   :  { %v99_v35 = vmul.f32 %v94_v31, %v76_v26  ;;  %v97_v36 = vmul.f32 %v86_v32, %v78_v27  ;;  %v313_v27 = vsel %vm312_vm4, %v310_v2, %v311_v22 }
  0x88   :  { %v101_v37 = vpack.c.bf16 %v99_v35, %v98_v33  ;;  %v100_v40 = vpack.c.bf16 %v97_v36, %v96_v34 }
  0x8a   :  { %v52_v42 = vpop.permute.xlu1 %51  ;;  %v47_v43 = vpop.permute.xlu0 %46  ;;  %1606 = vmatprep.mubr.msk.bf16.mxu0 %vm104_vm3, %v100_v40 }
  0x8b   :  { %v65_v46 = vmul.f32 %v52_v42, %v42_v38  ;;  %v64_v47 = vmul.f32 %v47_v43, %v43_v39  ;;  %1607 = vmatmul.mubr.msk.bf16.vlgmr.msra.gmra.mrb[0].mxu0 %vm104_vm3, %v101_v37  ;;  %v443_v37 = vsel %vm111_vm0, %v1491_v23, 0  ;;  %v406_v38 = vrot.slane %v1898_v17, 2 }
  0x8c   :  { %1611 = vmatpush3.bf16.msra.mxu0 %v171_v41 }
  0x8d   :  { %v68_v48 = vpack.c.bf16 %v65_v46, %v64_v47  ;;  %1748 = vmatprep.subr.msk.bf16.mxu0 %vm111_vm0, %v1485_v45  ;;  %v411_v40 = vsel %vm407_vm5, %v406_v38, %v403_v25  ;;  %v408_v41 = vsel %vm407_vm5, %v405_v21, %v406_v38  ;;  %v1769_v45 = vld [vmem:[%s2125_s4 + $0x8] sm:$0xff]   ;;  %v1816_v46 = vmov 0.0  }
  0x8e   :  { %v57_v49 = vpop.permute.xlu1 %56  ;;  %v62_v51 = vpop.permute.xlu0 %61  ;;  %1634 = vmatprep.subr.bf16.mxu1 %v1816_v46  ;;  %1636 = vmatprep.mubr.msk.bf16.mxu1 %vm1817_vm6, %v1816_v46 }
  0x8f   :  { %1612 = vmatprep.mubr.msk.bf16.mxu0 %vm104_vm3, %v68_v48  ;;  %v66_v53 = vmul.f32 %v57_v49, %v41_v50  ;;  %v67_v54 = vmul.f32 %v62_v51, %v40_v52  ;;  %1635 = vmatpush3.bf16.msra.mxu1 %v1769_v45  ;;  %v1772_v45 = vld [vmem:[%s2125_s4 + $0x38] sm:$0xff]  }
  0x90   :  { %1640 = vmatprep.subr.bf16.mxu1 %v1816_v46 }
  0x91   :  { %v69_v59 = vpack.c.bf16 %v67_v54, %v66_v53 }
  0x93   :  { %v224_v55 = vpop.permute.xlu1 %223  ;;  %v228_v56 = vpop.permute.xlu0 %227 }
  0x94   :  { %v238_v57 = vmul.f32 %v224_v55, %v1893_v16  ;;  %v239_v58 = vmul.f32 %v228_v56, %v1881_v13 }
  0x96   :  { %v242_v61 = vpack.c.bf16 %v239_v58, %v238_v57 }
  0x97   :  { %v232_v63 = vpop.permute.xlu1 %231  ;;  %1613 = vmatmul.mubr.msk.bf16.vlgmr.msra.gmra.mrb[0].mxu0 %vm104_vm3, %v69_v59 }
  0x98   :  { %1617 = vmatpush3.bf16.msra.mxu0 %v253_v60  ;;  %1618 = vmatprep.mubr.msk.bf16.mxu0 %vm104_vm3, %v242_v61  ;;  %v319_v4 = vpop.permute.xlu0 %318  ;;  %v240_v8 = vmul.f32 %v232_v63, %v1888_v15  ;;  %v409_v15 = vsel %vm407_vm5, %v404_v20, %v405_v21 }
  0x99   :  { %1749 = vmatprep.subr.msk.bf16.mxu0 %vm111_vm0, %v1488_v62  ;;  %v333_v9 = vmul.f32 %v319_v4, %v315_v5 }
  0x9b   :  { %v236_v3 = vpop.permute.xlu1 %235 }
  0x9c   :  { %v241_v6 = vmul.f32 %v236_v3, %v1898_v17  ;;  %v331_v19 = vpop.permute.xlu0 %330  ;;  %v1770_v17 = vld [vmem:[%s2125_s4 + $0x28] sm:$0xff]  }
  0x9d   :  { %v336_v31 = vmul.f32 %v331_v19, %v316_v28 }
  0x9e   :  { %v243_v12 = vpack.c.bf16 %v241_v6, %v240_v8 }
  0xa0   :  { %v323_v10 = vpop.permute.xlu1 %322 }
  0xa1   :  { %v334_v18 = vmul.f32 %v323_v10, %v314_v7  ;;  %v418_v13 = vpop.permute.xlu0 %417 }
  0xa2   :  { %v429_v16 = vmul.f32 %v418_v13, %v409_v15  ;;  %v533_v13 = vld [vmem:[%s2124_s3] sm:$0x1]  ;;  %v542_v15 = vsub.s32 0, %v1883_v14 }
  0xa3   :  { %v337_v24 = vpack.c.bf16 %v334_v18, %v333_v9  ;;  %1619 = vmatmul.mubr.msk.bf16.vlgmr.msra.gmra.mrb[0].mxu0 %vm104_vm3, %v243_v12 }
  0xa4   :  { %1623 = vmatpush3.bf16.msra.mxu0 %v348_v11  ;;  %v327_v26 = vpop.permute.xlu1 %326 }
  0xa5   :  { %1624 = vmatprep.mubr.msk.bf16.mxu0 %vm104_vm3, %v337_v24  ;;  %1750 = vmatprep.subr.msk.bf16.mxu0 %vm111_vm0, %v1491_v23  ;;  %v335_v30 = vmul.f32 %v327_v26, %v313_v27 }
  0xa7   :  { %v338_v35 = vpack.c.bf16 %v336_v31, %v335_v30 }
  0xa9   :  { %v414_v32 = vpop.permute.xlu1 %413 }
  0xaa   :  { %v428_v33 = vmul.f32 %v414_v32, %v410_v29  ;;  %v534_v29 = vld [vmem:[%s2124_s3 + $0x1] sm:$0x1] }
  0xac   :  { %v432_v34 = vpack.c.bf16 %v429_v16, %v428_v33 }
  0xad   :  { %v422_v36 = vpop.permute.xlu1 %421 }
  0xae   :  { %v430_v43 = vmul.f32 %v422_v36, %v408_v41 }
  0xaf   :  { %1625 = vmatmul.mubr.msk.bf16.vlgmr.msra.gmra.mrb[0].mxu0 %vm104_vm3, %v338_v35 }
  0xb0   :  { %1629 = vmatpush3.bf16.msra.mxu0 %v443_v37  ;;  %1630 = vmatprep.mubr.msk.bf16.mxu0 %vm104_vm3, %v432_v34 }
  0xb1   :  { %v426_v39 = vpop.permute.xlu1 %425  ;;  %1664 = vmatprep.subr.bf16.mxu0 %v1816_v46 }
  0xb2   :  { %v431_v42 = vmul.f32 %v426_v39, %v411_v40 }
  0xb4   :  { %v433_v44 = vpack.c.bf16 %v431_v42, %v430_v43 }
  0xbb   :  { %1631 = vmatmul.mubr.msk.bf16.vlgmr.msra.gmra.mrb[0].mxu0 %vm104_vm3, %v433_v44  ;;  %v1771_v44 = vld [vmem:[%s2125_s4] sm:$0xff]  }
  0xbc   :  { %1665 = vmatpush3.bf16.msra.mxu0 %v1770_v17  ;;  %1666 = vmatprep.mubr.msk.bf16.mxu0 %vm1817_vm6, %v1816_v46 }
  0xbd   :  { %1676 = vmatprep.subr.bf16.mxu0 %v1816_v46 }
 0x18e   :  { %v1632_v47 = vpop.f32.mrb[0].mxu0 }
 0x18f   :  { %v479_v48 = vpop.f32.mrb[1].mxu0  ;;  %v515_v52 = vmul.f32 %v1632_v47, %v1632_v47  ;;  %v502_v57 = vsel %vm498_vm7, %v1632_v47, 0.0 }
 0x190   :  { %v513_v49 = vmul.f32 %v479_v48, %v479_v48  ;;  %v1633_v50 = vpop.f32.mrb[2].mxu0  ;;  %v499_v53 = vsel %vm498_vm7, %v479_v48, 0.0 }
 0x191   :  { %v482_v51 = vpop.f32.mrb[3].mxu0  ;;  %v516_v59 = vmul.f32 %v1633_v50, %v1633_v50  ;;  %v520_v63 = vsel %vm498_vm7, %v515_v52, 0.0  ;;  %v504_v0 = vsel %vm498_vm7, %v1633_v50, 0.0  ;;  %v1773_v52 = vld [vmem:[%s2125_s4 + $0x10] sm:$0xff]  }
 0x192   :  { %v500_v54 = vsel %vm498_vm7, %v482_v51, 0.0  ;;  %v514_v55 = vmul.f32 %v482_v51, %v482_v51  ;;  %v517_v58 = vsel %vm498_vm7, %v513_v49, 0.0 }
 0x193   :  { %v501_v56 = vadd.f32 %v500_v54, %v499_v53  ;;  %v522_v3 = vsel %vm498_vm7, %v516_v59, 0.0  ;;  %v1774_v53 = vld [vmem:[%s2125_s4 + $0x48] sm:$0xff]   ;;  %v1776_v59 = vld [vmem:[%s2125_s4 + $0x58] sm:$0xff]  }
 0x194   :  { %v518_v60 = vsel %vm498_vm7, %v514_v55, 0.0 }
 0x195   :  { %v503_v61 = vadd.f32 %v502_v57, %v501_v56  ;;  %v519_v62 = vadd.f32 %v518_v60, %v517_v58  ;;  %v1775_v58 = vld [vmem:[%s2125_s4 + $0x18] sm:$0xff]  }
 0x197   :  { %v505_v1 = vadd.f32 %v504_v0, %v503_v61  ;;  %v521_v2 = vadd.f32 %v520_v63, %v519_v62  ;;  %v1777_v0 = vld [vmem:[%s2125_s4 + $0x20] sm:$0xff]  }
 0x199   :  { %v506_v4 = vrot.slane %v505_v1, 4  ;;  %v523_v5 = vadd.f32 %v522_v3, %v521_v2 }
 0x19b   :  { %v507_v6 = vadd.f32 %v506_v4, %v505_v1  ;;  %v524_v7 = vrot.slane %v523_v5, 4  ;;  %v1778_v1 = vld [vmem:[%s2125_s4 + $0x68] sm:$0xff]  }
 0x19d   :  { %v508_v8 = vrot.slane %v507_v6, 2  ;;  %v525_v9 = vadd.f32 %v524_v7, %v523_v5  ;;  %v1780_v7 = vld [vmem:[%s2125_s4 + $0x78] sm:$0xff]  }
 0x19f   :  { %v509_v10 = vadd.f32 %v508_v8, %v507_v6  ;;  %v526_v11 = vrot.slane %v525_v9, 2  ;;  %v1779_v6 = vld [vmem:[%s2125_s4 + $0x30] sm:$0xff]  }
 0x1a1   :  { %v510_v12 = vrot.slane %v509_v10, 1  ;;  %v527_v18 = vadd.f32 %v526_v11, %v525_v9 }
 0x1a3   :  { %v511_v19 = vadd.f32 %v510_v12, %v509_v10  ;;  %v528_v20 = vrot.slane %v527_v18, 1  ;;  %v1781_v12 = vld [vmem:[%s2125_s4 + $0x40] sm:$0xff]  }
 0x1a5   :  { %v512_v21 = vmul.f32 0.03125, %v511_v19  ;;  %v529_v22 = vadd.f32 %v528_v20, %v527_v18 }
 0x1a7   :  { %v530_v23 = vmul.f32 0.03125, %v529_v22  ;;  %v531_v24 = vmul.f32 %v512_v21, %v512_v21 }
 0x1a9   :  { %v532_v25 = vsub.f32 %v530_v23, %v531_v24  ;;  %v1783_v24 = vld [vmem:[%s2125_s4 + $0x60] sm:$0xff]  }
 0x1ab   :  { %v535_v26 = vadd.f32 0.001, %v532_v25 }
 0x1ad   :  { %1785 = vrsqrt.f32 %v535_v26 }
 0x1b7   :  { %v1786_v27 = vpop.eup %1785 }
 0x1b8   :  { %v537_v28 = vmul.f32 %v1786_v27, %v533_v13  ;;  %v1784_v13 = vld [vmem:[%s2125_s4 + $0x70] sm:$0xff]  }
 0x1ba   :  { %v538_v16 = vmul.f32 %v537_v28, %v512_v21  ;;  %v543_v30 = vrot.slane %v537_v28, %v542_v15  ;;  %v1782_v21 = vld [vmem:[%s2125_s4 + $0x50] sm:$0xff]  }
 0x1bc   :  { %v539_v31 = vsub.f32 %v534_v29, %v538_v16  ;;  %v544_v32 = vmul.f32 %v543_v30, %v479_v48  ;;  %v545_v33 = vmul.f32 %v543_v30, %v482_v51  ;;  %v546_v34 = vmul.f32 %v1632_v47, %v543_v30 }
 0x1bd   :  { %v547_v35 = vmul.f32 %v1633_v50, %v543_v30 }
 0x1be   :  { %v551_v36 = vrot.slane %v539_v31, %v542_v15 }
 0x1c0   :  { %v552_v37 = vadd.f32 %v551_v36, %v544_v32  ;;  %v553_v38 = vadd.f32 %v551_v36, %v545_v33  ;;  %v554_v39 = vadd.f32 %v551_v36, %v546_v34  ;;  %v555_v40 = vadd.f32 %v551_v36, %v547_v35 }
 0x1c2   :  { %v556_v41 = vmax.f32 %v552_v37, 0.0  ;;  %v557_v14 = vmax.f32 %v553_v38, 0.0  ;;  %v558_v42 = vmax.f32 %v554_v39, 0.0  ;;  %v559_v43 = vmax.f32 %v555_v40, 0.0 }
 0x1c4   :  { %560 = vst.msk [vmem:[#allocation2] sm:$0xff] %vm498_vm7, %v556_v41  ;;  %561 = vst.msk [vmem:[#allocation2 + $0x8] sm:$0xff] %vm498_vm7, %v557_v14 }
 0x1c5   :  { %562 = vst.msk [vmem:[#allocation2 + $0x10] sm:$0xff] %vm498_vm7, %v558_v42  ;;  %563 = vst.msk [vmem:[#allocation2 + $0x18] sm:$0xff] %vm498_vm7, %v559_v43 }
 0x1cc   :  { %v569_v17 = vld [vmem:[#allocation2 + $0x1] ss:$16 sm:$0x3]  ;;  %v841_v47 = vld [vmem:[#allocation2 + $0x5] ss:$16 sm:$0x3] }
 0x1cd   :  { %v570_v48 = vpack.c.bf16 %v569_v17, %v569_v17  ;;  %v842_v49 = vpack.c.bf16 %v841_v47, %v841_v47  ;;  %v564_v50 = vld [vmem:[#allocation2] ss:$16 sm:$0x3]  ;;  %v953_v51 = vld [vmem:[#allocation2 + $0x7] ss:$16 sm:$0x3] }
 0x1ce   :  { %v565_v54 = vpack.c.bf16 %v564_v50, %v564_v50  ;;  %v954_v55 = vpack.c.bf16 %v953_v51, %v953_v51  ;;  %v673_v56 = vld [vmem:[#allocation2 + $0x2] ss:$16 sm:$0x3]  ;;  %v1065_v57 = vld [vmem:[#allocation2 + $0x9] ss:$16 sm:$0x3] }
 0x1cf   :  { %1637 = vmatmul.mubr.msk.bf16.vlgmr.msra.gmra.mrb[0].mxu1 %vm498_vm7, %v570_v48  ;;  %1667 = vmatmul.mubr.msk.bf16.vlgmr.msra.gmra.mrb[4].mxu0 %vm498_vm7, %v842_v49  ;;  %v674_v60 = vpack.c.bf16 %v673_v56, %v673_v56  ;;  %v1066_v61 = vpack.c.bf16 %v1065_v57, %v1065_v57  ;;  %v729_v62 = vld [vmem:[#allocation2 + $0x3] ss:$16 sm:$0x3]  ;;  %v1177_v63 = vld [vmem:[#allocation2 + $0xb] ss:$16 sm:$0x3] }
 0x1d0   :  { %1641 = vmatpush3.bf16.msra.mxu1 %v1771_v44  ;;  %1677 = vmatpush3.bf16.msra.mxu0 %v1772_v45  ;;  %v730_v2 = vpack.c.bf16 %v729_v62, %v729_v62  ;;  %v1178_v3 = vpack.c.bf16 %v1177_v63, %v1177_v63  ;;  %v785_v4 = vld [vmem:[#allocation2 + $0x4] ss:$16 sm:$0x3]  ;;  %v1289_v5 = vld [vmem:[#allocation2 + $0xd] ss:$16 sm:$0x3] }
 0x1d1   :  { %1642 = vmatprep.mubr.msk.bf16.mxu1 %vm1817_vm6, %v1816_v46  ;;  %1646 = vmatprep.subr.bf16.mxu1 %v1816_v46  ;;  %v786_v8 = vpack.c.bf16 %v785_v4, %v785_v4  ;;  %v1290_v9 = vpack.c.bf16 %v1289_v5, %v1289_v5  ;;  %v897_v10 = vld [vmem:[#allocation2 + $0x6] ss:$16 sm:$0x3]  ;;  %v1401_v11 = vld [vmem:[#allocation2 + $0xf] ss:$16 sm:$0x3] }
 0x1d2   :  { %1678 = vmatprep.mubr.msk.bf16.mxu0 %vm1817_vm6, %v1816_v46  ;;  %1688 = vmatprep.subr.bf16.mxu0 %v1816_v46  ;;  %v898_v18 = vpack.c.bf16 %v897_v10, %v897_v10  ;;  %v1402_v19 = vpack.c.bf16 %v1401_v11, %v1401_v11  ;;  %v1009_v20 = vld [vmem:[#allocation2 + $0x8] ss:$16 sm:$0x3]  ;;  %v1121_v23 = vld [vmem:[#allocation2 + $0xa] ss:$16 sm:$0x3] }
 0x1d3   :  { %v1010_v22 = vpack.c.bf16 %v1009_v20, %v1009_v20  ;;  %v1122_v25 = vpack.c.bf16 %v1121_v23, %v1121_v23  ;;  %v1233_v26 = vld [vmem:[#allocation2 + $0xc] ss:$16 sm:$0x3]  ;;  %v1345_v27 = vld [vmem:[#allocation2 + $0xe] ss:$16 sm:$0x3] }
 0x1d4   :  { %v1234_v15 = vpack.c.bf16 %v1233_v26, %v1233_v26  ;;  %v1346_v28 = vpack.c.bf16 %v1345_v27, %v1345_v27 }
 0x1d7   :  { %1643 = vmatmul.mubr.msk.bf16.vlgmr.msra.gmra.mrb[4].mxu1 %vm498_vm7, %v565_v54  ;;  %1679 = vmatmul.mubr.msk.bf16.vlgmr.msra.gmra.mrb[8].mxu0 %vm498_vm7, %v954_v55 }
 0x1d8   :  { %1647 = vmatpush3.bf16.msra.mxu1 %v1773_v52  ;;  %1689 = vmatpush3.bf16.msra.mxu0 %v1774_v53 }
 0x1d9   :  { %1648 = vmatprep.mubr.msk.bf16.mxu1 %vm1817_vm6, %v1816_v46  ;;  %1652 = vmatprep.subr.bf16.mxu1 %v1816_v46 }
 0x1da   :  { %1690 = vmatprep.mubr.msk.bf16.mxu0 %vm1817_vm6, %v1816_v46  ;;  %1700 = vmatprep.subr.bf16.mxu0 %v1816_v46 }
 0x1df   :  { %1649 = vmatmul.mubr.msk.bf16.vlgmr.msra.gmra.mrb[8].mxu1 %vm498_vm7, %v674_v60  ;;  %1691 = vmatmul.mubr.msk.bf16.vlgmr.msra.gmra.mrb[12].mxu0 %vm498_vm7, %v1066_v61 }
 0x1e0   :  { %1653 = vmatpush3.bf16.msra.mxu1 %v1775_v58  ;;  %1701 = vmatpush3.bf16.msra.mxu0 %v1776_v59 }
 0x1e1   :  { %1654 = vmatprep.mubr.msk.bf16.mxu1 %vm1817_vm6, %v1816_v46  ;;  %1658 = vmatprep.subr.bf16.mxu1 %v1816_v46 }
 0x1e2   :  { %1702 = vmatprep.mubr.msk.bf16.mxu0 %vm1817_vm6, %v1816_v46  ;;  %1712 = vmatprep.subr.bf16.mxu0 %v1816_v46 }
 0x1e7   :  { %1655 = vmatmul.mubr.msk.bf16.vlgmr.msra.gmra.mrb[12].mxu1 %vm498_vm7, %v730_v2  ;;  %1703 = vmatmul.mubr.msk.bf16.vlgmr.msra.gmra.mrb[16].mxu0 %vm498_vm7, %v1178_v3 }
 0x1e8   :  { %1659 = vmatpush3.bf16.msra.mxu1 %v1777_v0  ;;  %1713 = vmatpush3.bf16.msra.mxu0 %v1778_v1 }
 0x1e9   :  { %1660 = vmatprep.mubr.msk.bf16.mxu1 %vm1817_vm6, %v1816_v46  ;;  %1670 = vmatprep.subr.bf16.mxu1 %v1816_v46 }
 0x1ea   :  { %1714 = vmatprep.mubr.msk.bf16.mxu0 %vm1817_vm6, %v1816_v46  ;;  %1724 = vmatprep.subr.bf16.mxu0 %v1816_v46 }
 0x1ef   :  { %1661 = vmatmul.mubr.msk.bf16.vlgmr.msra.gmra.mrb[16].mxu1 %vm498_vm7, %v786_v8  ;;  %1715 = vmatmul.mubr.msk.bf16.vlgmr.msra.gmra.mrb[20].mxu0 %vm498_vm7, %v1290_v9 }
 0x1f0   :  { %1671 = vmatpush3.bf16.msra.mxu1 %v1779_v6  ;;  %1725 = vmatpush3.bf16.msra.mxu0 %v1780_v7 }
 0x1f1   :  { %1672 = vmatprep.mubr.msk.bf16.mxu1 %vm1817_vm6, %v1816_v46  ;;  %1682 = vmatprep.subr.bf16.mxu1 %v1816_v46 }
 0x1f2   :  { %1726 = vmatprep.mubr.msk.bf16.mxu0 %vm1817_vm6, %v1816_v46 }
 0x1f7   :  { %1673 = vmatmul.mubr.msk.bf16.vlgmr.msra.gmra.mrb[20].mxu1 %vm498_vm7, %v898_v18  ;;  %1727 = vmatmul.mubr.msk.bf16.vlgmr.msra.gmra.mrb[24].mxu0 %vm498_vm7, %v1402_v19 }
 0x1f8   :  { %1683 = vmatpush3.bf16.msra.mxu1 %v1781_v12  ;;  %1684 = vmatprep.mubr.msk.bf16.mxu1 %vm1817_vm6, %v1816_v46 }
 0x1f9   :  { %1694 = vmatprep.subr.bf16.mxu1 %v1816_v46 }
 0x1ff   :  { %1685 = vmatmul.mubr.msk.bf16.vlgmr.msra.gmra.mrb[24].mxu1 %vm498_vm7, %v1010_v22 }
 0x200   :  { %1695 = vmatpush3.bf16.msra.mxu1 %v1782_v21  ;;  %1696 = vmatprep.mubr.msk.bf16.mxu1 %vm1817_vm6, %v1816_v46 }
 0x201   :  { %1706 = vmatprep.subr.bf16.mxu1 %v1816_v46 }
 0x207   :  { %1697 = vmatmul.mubr.msk.bf16.vlgmr.msra.gmra.mrb[28].mxu1 %vm498_vm7, %v1122_v25 }
 0x208   :  { %1707 = vmatpush3.bf16.msra.mxu1 %v1783_v24  ;;  %1708 = vmatprep.mubr.msk.bf16.mxu1 %vm1817_vm6, %v1816_v46 }
 0x209   :  { %1718 = vmatprep.subr.bf16.mxu1 %v1816_v46 }
 0x20f   :  { %1709 = vmatmul.mubr.msk.bf16.vlgmr.msra.gmra.mrb[32].mxu1 %vm498_vm7, %v1234_v15 }
 0x210   :  { %1719 = vmatpush3.bf16.msra.mxu1 %v1784_v13  ;;  %1720 = vmatprep.mubr.msk.bf16.mxu1 %vm1817_vm6, %v1816_v46 }
 0x217   :  { %1721 = vmatmul.mubr.msk.bf16.vlgmr.msra.gmra.mrb[36].mxu1 %vm498_vm7, %v1346_v28 }
 0x2a2   :  { %v617_v29 = vpop.f32.mrb[0].mxu1  ;;  %v889_v16 = vpop.f32.mrb[4].mxu0 }
 0x2a3   :  { %v1638_v30 = vpop.f32.mrb[1].mxu1  ;;  %v1668_v31 = vpop.f32.mrb[5].mxu0 }
 0x2a4   :  { %v620_v32 = vpop.f32.mrb[2].mxu1  ;;  %v892_v33 = vpop.f32.mrb[6].mxu0 }
 0x2a5   :  { %v1639_v34 = vpop.f32.mrb[3].mxu1  ;;  %v1669_v35 = vpop.f32.mrb[7].mxu0 }
 0x2aa   :  { %v666_v36 = vpop.f32.mrb[4].mxu1  ;;  %v1001_v37 = vpop.f32.mrb[8].mxu0 }
 0x2ab   :  { %v667_v38 = vadd.f32 %v666_v36, %v617_v29  ;;  %v1644_v39 = vpop.f32.mrb[5].mxu1  ;;  %v1680_v40 = vpop.f32.mrb[9].mxu0 }
 0x2ac   :  { %v669_v41 = vpop.f32.mrb[6].mxu1  ;;  %v1004_v14 = vpop.f32.mrb[10].mxu0 }
 0x2ad   :  { %v1645_v46 = vpop.f32.mrb[7].mxu1  ;;  %v1681_v42 = vpop.f32.mrb[11].mxu0  ;;  %v1556_v41 = vld [vmem:[%s2126_s5] ss:$0 sm:$0xff] }
 0x2b2   :  { %v721_v43 = vpop.f32.mrb[8].mxu1  ;;  %v1113_v44 = vpop.f32.mrb[12].mxu0 }
 0x2b3   :  { %v727_v45 = vadd.f32 %v721_v43, %v667_v38  ;;  %v1650_v17 = vpop.f32.mrb[9].mxu1  ;;  %v1692_v47 = vpop.f32.mrb[13].mxu0 }
 0x2b4   :  { %v724_v48 = vpop.f32.mrb[10].mxu1  ;;  %v1116_v49 = vpop.f32.mrb[14].mxu0 }
 0x2b5   :  { %v1651_v50 = vpop.f32.mrb[11].mxu1  ;;  %v1693_v51 = vpop.f32.mrb[15].mxu0 }
 0x2ba   :  { %v777_v52 = vpop.f32.mrb[12].mxu1  ;;  %v1225_v53 = vpop.f32.mrb[16].mxu0 }
 0x2bb   :  { %v783_v54 = vadd.f32 %v777_v52, %v727_v45  ;;  %v1656_v55 = vpop.f32.mrb[13].mxu1  ;;  %v1704_v56 = vpop.f32.mrb[17].mxu0 }
 0x2bc   :  { %v780_v57 = vpop.f32.mrb[14].mxu1  ;;  %v1228_v58 = vpop.f32.mrb[18].mxu0 }
 0x2bd   :  { %v1657_v59 = vpop.f32.mrb[15].mxu1  ;;  %v1705_v60 = vpop.f32.mrb[19].mxu0 }
 0x2c2   :  { %v833_v61 = vpop.f32.mrb[16].mxu1  ;;  %v1337_v62 = vpop.f32.mrb[20].mxu0 }
 0x2c3   :  { %v839_v63 = vadd.f32 %v833_v61, %v783_v54  ;;  %v1662_v0 = vpop.f32.mrb[17].mxu1  ;;  %v1716_v1 = vpop.f32.mrb[21].mxu0 }
 0x2c4   :  { %v836_v2 = vpop.f32.mrb[18].mxu1  ;;  %v1340_v3 = vpop.f32.mrb[22].mxu0 }
 0x2c5   :  { %v1663_v4 = vpop.f32.mrb[19].mxu1  ;;  %v1717_v5 = vpop.f32.mrb[23].mxu0  ;;  %v895_v6 = vadd.f32 %v889_v16, %v839_v63 }
 0x2ca   :  { %v945_v7 = vpop.f32.mrb[20].mxu1  ;;  %v1449_v8 = vpop.f32.mrb[24].mxu0 }
 0x2cb   :  { %v951_v9 = vadd.f32 %v945_v7, %v895_v6  ;;  %v1674_v10 = vpop.f32.mrb[21].mxu1  ;;  %v1728_v11 = vpop.f32.mrb[25].mxu0 }
 0x2cc   :  { %v948_v12 = vpop.f32.mrb[22].mxu1  ;;  %v1452_v18 = vpop.f32.mrb[26].mxu0 }
 0x2cd   :  { %v1675_v19 = vpop.f32.mrb[23].mxu1  ;;  %v1729_v20 = vpop.f32.mrb[27].mxu0  ;;  %v1007_v21 = vadd.f32 %v1001_v37, %v951_v9 }
 0x2d2   :  { %v1057_v22 = vpop.f32.mrb[24].mxu1 }
 0x2d3   :  { %v1063_v23 = vadd.f32 %v1057_v22, %v1007_v21  ;;  %v1686_v24 = vpop.f32.mrb[25].mxu1 }
 0x2d4   :  { %v1060_v25 = vpop.f32.mrb[26].mxu1 }
 0x2d5   :  { %v1687_v26 = vpop.f32.mrb[27].mxu1  ;;  %v1119_v13 = vadd.f32 %v1113_v44, %v1063_v23 }
 0x2da   :  { %v1169_v15 = vpop.f32.mrb[28].mxu1 }
 0x2db   :  { %v1175_v27 = vadd.f32 %v1169_v15, %v1119_v13  ;;  %v1698_v28 = vpop.f32.mrb[29].mxu1 }
 0x2dc   :  { %v1172_v29 = vpop.f32.mrb[30].mxu1 }
 0x2dd   :  { %v1699_v16 = vpop.f32.mrb[31].mxu1  ;;  %v1231_v30 = vadd.f32 %v1225_v53, %v1175_v27 }
 0x2e2   :  { %v1281_v31 = vpop.f32.mrb[32].mxu1 }
 0x2e3   :  { %v1287_v32 = vadd.f32 %v1281_v31, %v1231_v30  ;;  %v1710_v33 = vpop.f32.mrb[33].mxu1 }
 0x2e4   :  { %v1284_v34 = vpop.f32.mrb[34].mxu1 }
 0x2e5   :  { %v1711_v35 = vpop.f32.mrb[35].mxu1  ;;  %v1343_v36 = vadd.f32 %v1337_v62, %v1287_v32 }
 0x2ea   :  { %v1393_v38 = vpop.f32.mrb[36].mxu1 }
 0x2eb   :  { %v1399_v37 = vadd.f32 %v1393_v38, %v1343_v36  ;;  %v1722_v39 = vpop.f32.mrb[37].mxu1 }
 0x2ec   :  { %v1396_v40 = vpop.f32.mrb[38].mxu1 }
 0x2ed   :  { %v1455_v14 = vadd.f32 %v1449_v8, %v1399_v37  ;;  %v1723_v46 = vpop.f32.mrb[39].mxu1 }
 0x2ef   :  { %v1463_v42 = vadd.f32 %v1556_v41, %v1455_v14 }
 0x2f1   :  { %1465 = vst.msk [vmem:[#allocation3] sm:$0x3] %vm1464_vm8, %v1463_v42 }
 0x2f2   :  { %1798 = shalt.err (!%p1795_p4)
}
 0x2f3   :  { %s1799_s1 = scalar_lea.hbm %s2127_s6, 32 }
 0x2f4   :  { %p1800_p5 = scmp.ne.s32.totalorder %s2127_s6, %s1799_s1  ;;  %p1803_p6 = scmp.lt.u32.totalorder %s1799_s1, %s2127_s6 }
 0x2f6   :  { %p1805_p7 = pnand %p1803_p6, %p1800_p5 }
 0x2f8   :  { %1808 = shalt.err (!%p1805_p7)
}
 0x2f9   :  { %1475 = dma.vmem_to_hbm [thread:$0]  %s1473_s29, 32, %s2127_s6, [#allocation4]  }
 0x2fa   :  { %1809 = dma.done.wait [#allocation4], 32  }
 0x2fb   :  { %1810 = vsyncadd [#allocation4], 4294967264 }
 0x2fc   :  { %1479 = vsyncpa [#allocation4], 1 }

</bundles_post_ra>
